<compile_context>
chip_gen: v7x
topology: tpu7x:2x2x1
jax: 0.10.0
libtpu: 0.0.40
codegen_flags: <defaults>
</compile_context>

<pallas_src>
import functools

import jax
import jax.numpy as jnp
from jax.experimental import pallas as pl
from jax.experimental.pallas import tpu as pltpu


def _round_up(v, m):
    return ((v + m - 1) // m) * m


def _pick_tile(total, requested, quantum):
    """Largest multiple of `quantum` that divides `total` and is <= requested."""
    best = quantum
    t = quantum
    limit = min(total, requested)
    while t <= limit:
        if total % t == 0:
            best = t
        t += quantum
    return best


# ----------------------------------------------------------------------------
# Kernels
# ----------------------------------------------------------------------------
def _lr_matmul_fast_kernel(x_ref, w_ref, o_ref):
    """1-D grid over M.  Full (Kp, Np) weight resident in VMEM.

    x_ref: (tm, Kp)   activations (bf16 or f32)
    w_ref: (Kp, Np)   pre-transposed weight (same block every step -> resident)
    o_ref: (tm, Np)   f32 output
    """
    o_ref[...] = jnp.dot(x_ref[...], w_ref[...],
                         preferred_element_type=jnp.float32)


def _lr_matmul_acc_kernel(x_ref, w_ref, o_ref):
    """3-D (M, N, K) grid.  Accumulate directly into the resident f32 output
    tile (its index_map ignores the K axis), no scratch accumulator needed.

    x_ref: (tm, tk), w_ref: (tk, tn), o_ref: (tm, tn) f32.
    """
    @pl.when(pl.program_id(2) == 0)
    def _():
        o_ref[...] = jnp.zeros_like(o_ref)

    o_ref[...] += jnp.dot(x_ref[...], w_ref[...],
                          preferred_element_type=jnp.float32)


# ----------------------------------------------------------------------------
# One-time weight preparation (hoist out of the per-call forward)
# ----------------------------------------------------------------------------
def prepare_lr_weight(weight, compute_dtype=jnp.bfloat16):
    """Pad the nn.Linear weight (n, K) to (Np, Kp) multiples of 128, cast to
    the compute dtype, and transpose to (Kp, Np).  Call ONCE per parameter
    (e.g. at model load); the result is reused by every forward call so the
    pad / cast / transpose HBM traffic amortizes to zero.

    Padded K rows / N columns are zero-filled, so the padding is exact for the
    reduction (zeros contribute nothing) and the extra N columns are sliced
    off in the forward."""
    n, k = weight.shape
    np_ = _round_up(n, 128)
    kp = _round_up(k, 128)
    w = weight
    if (np_, kp) != (n, k):
        w = jnp.pad(w, ((0, np_ - n), (0, kp - k)))
    return jnp.transpose(w).astype(compute_dtype)  # (Kp, Np)


# ----------------------------------------------------------------------------
# Forward pass (always Pallas)
# ----------------------------------------------------------------------------
@functools.partial(
    jax.jit,
    static_argnames=("n", "tm", "tn", "tk", "fast_path_weight_bytes"),
)
def lr_layer_forward(x, w_prepped, *, n, tm=512, tn=512, tk=512,
                     fast_path_weight_bytes=4 * 1024 * 1024):
    """LRLayer forward: y = x @ W.T, given the prepared (Kp, Np) weight.

    Args:
      x:         (batch, input_dim) activations (any float dtype).
      w_prepped: (Kp, Np) output of prepare_lr_weight().
      n:         logical output dim (columns beyond n are padding, sliced off).
      tm/tn/tk:  requested tile sizes (clamped / snapped to valid divisors).
      fast_path_weight_bytes: if the whole padded weight is at most this many
        bytes, use the single-pass weight-resident path.

    Returns:
      (batch, n) float32 array.
    """
    batch, input_dim = x.shape
    kp, np_ = w_prepped.shape
    assert input_dim <= kp and n <= np_, "weight was prepared for other dims"

    cd = w_prepped.dtype
    cd_size = jnp.dtype(cd).itemsize
    # Sublane packing: f32 -> 8 rows per vreg, bf16 -> 16.
    sublane = 8 if cd_size >= 4 else 16

    # Per-call activation handling only: cast + pad x (weight is pre-prepared).
    x = x.astype(cd)
    tm = _round_up(min(tm, _round_up(batch, sublane)), sublane)
    mp = _round_up(batch, tm)
    if (mp, kp) != (batch, input_dim):
        x = jnp.pad(x, ((0, mp - batch), (0, kp - input_dim)))

    flops = 2 * mp * kp * np_
    use_fast_path = kp * np_ * cd_size <= fast_path_weight_bytes

    if use_fast_path:
        # Typical LRLayer regime (small n): whole weight resident in VMEM,
        # single streaming pass over x, no K/N loops, no init/finalize.
        grid = (mp // tm,)
        in_specs = [
            pl.BlockSpec((tm, kp), lambda i: (i, 0)),
            pl.BlockSpec((kp, np_), lambda i: (0, 0)),  # same block -> resident
        ]
        out_specs = pl.BlockSpec((tm, np_), lambda i: (i, 0))
        kernel = _lr_matmul_fast_kernel
        dim_sem = ("parallel",)
        working_set = (kp * np_ * cd_size          # resident weight
                       + 2 * tm * kp * cd_size     # double-buffered x tile
                       + 2 * tm * np_ * 4)         # double-buffered f32 out
        bytes_accessed = cd_size * (mp * kp + kp * np_) + 4 * mp * np_
    else:
        # General 3-D (M, N, K) tiled path.  Tiles must divide the prepared
        # padded weight dims exactly.
        tn = _pick_tile(np_, tn, 128)
        tk = _pick_tile(kp, tk, 128)
        # v7x has 2 TensorCores: make sure at least one "parallel" axis has
        # >= 2 blocks when possible (no-op on v5e/v6e).
        if mp // tm == 1 and np_ // tn == 1 and np_ % 256 == 0:
            tn = np_ // 2
        grid = (mp // tm, np_ // tn, kp // tk)
        in_specs = [
            pl.BlockSpec((tm, tk), lambda i, j, kk: (i, kk)),
            pl.BlockSpec((tk, tn), lambda i, j, kk: (kk, j)),
        ]
        out_specs = pl.BlockSpec((tm, tn), lambda i, j, kk: (i, j))
        kernel = _lr_matmul_acc_kernel
        dim_sem = ("parallel", "parallel", "arbitrary")
        working_set = (2 * (tm * tk + tk * tn) * cd_size  # double-buffered ins
                       + 2 * tm * tn * 4)                 # resident/DB f32 out
        # Account for re-reads: x is streamed once per N block, W once per
        # M block under the 3-D grid.
        bytes_accessed = (cd_size * (mp * kp * (np_ // tn)
                                     + kp * np_ * (mp // tm))
                          + 4 * mp * np_)

    # Keep the scoped VMEM request comfortably inside v7x's 64 MiB physical
    # VMEM (48 MiB cap leaves headroom for compiler scratch / semaphores);
    # v5e/v6e have 128 MiB so this is never binding there at these tile sizes.
    vmem_limit = int(min(max(3 * working_set, 16 * 1024 * 1024),
                         48 * 1024 * 1024))

    out = pl.pallas_call(
        kernel,
        out_shape=jax.ShapeDtypeStruct((mp, np_), jnp.float32),
        grid_spec=pltpu.PrefetchScalarGridSpec(
            num_scalar_prefetch=0,
            grid=grid,
            in_specs=in_specs,
            out_specs=out_specs,
        ),
        compiler_params=pltpu.CompilerParams(
            dimension_semantics=dim_sem,
            vmem_limit_bytes=vmem_limit,
        ),
        cost_estimate=pl.CostEstimate(
            flops=int(flops),
            transcendentals=0,
            bytes_accessed=int(bytes_accessed),
        ),
    )(x, w_prepped)

    if (mp, np_) != (batch, n):
        out = out[:batch, :n]
    return out


# ----------------------------------------------------------------------------
# Convenience wrapper from the raw nn.Linear weight, with tiny-problem dispatch
# ----------------------------------------------------------------------------
def lr_layer_apply(x, weight, *, compute_dtype=jnp.bfloat16,
                   min_flops_for_pallas=1 << 24):
    """LRLayer.forward(x) from the raw (n, input_dim) weight.

    NOTE: in a real model, call prepare_lr_weight() once at parameter-load
    time and reuse the result across calls; this wrapper re-prepares it."""
    batch, _ = x.shape
    n, k = weight.shape
    if 2 * batch * k * n < min_flops_for_pallas:
        # Tiny problem: a fused XLA dot beats pallas launch/pipeline overhead.
        return jnp.dot(x, weight.T, preferred_element_type=jnp.float32)
    w_prepped = prepare_lr_weight(weight, compute_dtype)
    return lr_layer_forward(x, w_prepped, n=n)


if __name__ == "__main__":
    # Module config: LRLayer(n, input_dim) -> Linear(input_dim, n, bias=False)
    n = 16          # output_dim
    input_dim = 32
    batch = 8

    key = jax.random.PRNGKey(0)
    kx, kw, kx2, kw2 = jax.random.split(key, 4)

    x = jax.random.normal(kx, (batch, input_dim), dtype=jnp.float32)
    # Weight in nn.Linear convention (n, input_dim); values in [0, 1]
    # consistent with the module's clip() range.
    weight = jax.random.uniform(kw, (n, input_dim), dtype=jnp.float32)
    y_ref = x @ weight.T

    # 1) Exact-f32 path, weight-resident fast kernel (typical LRLayer regime).
    w_f32 = prepare_lr_weight(weight, compute_dtype=jnp.float32)
    y = jax.block_until_ready(lr_layer_forward(x, w_f32, n=n))
    assert y.shape == (batch, n)
    assert jnp.allclose(y, y_ref, atol=1e-5, rtol=1e-5)

    # 2) Default bf16 compute path (f32 accumulation / f32 output).
    w_bf16 = prepare_lr_weight(weight, compute_dtype=jnp.bfloat16)
    y16 = jax.block_until_ready(lr_layer_forward(x, w_bf16, n=n))
    assert y16.shape == (batch, n)
    assert jnp.allclose(y16, y_ref, atol=0.05, rtol=0.02)

    # 3) General 3-D (M, N, K) accumulation path, forced at small shapes.
    n2, k2, b2 = 256, 256, 16
    x2 = jax.random.normal(kx2, (b2, k2), dtype=jnp.float32)
    w2 = jax.random.uniform(kw2, (n2, k2), dtype=jnp.float32)
    w2_prepped = prepare_lr_weight(w2, compute_dtype=jnp.bfloat16)
    y2 = jax.block_until_ready(
        lr_layer_forward(x2, w2_prepped, n=n2, tn=128, tk=128,
                         fast_path_weight_bytes=0))
    y2_ref = x2 @ w2.T
    assert y2.shape == (b2, n2)
    assert jnp.allclose(y2, y2_ref, atol=0.3, rtol=0.03)

    # 4) Convenience dispatch: tiny case routed to a fused XLA dot.
    y_xla = jax.block_until_ready(lr_layer_apply(x, weight))
    assert jnp.allclose(y_xla, y_ref, atol=1e-5, rtol=1e-5)

    print("KERNEL_OK")
</pallas_src>

<mosaic_0001>
module attributes {stable_mosaic.version = 11 : i64} {
  func.func @_lr_matmul_fast_kernel(%arg0: i32, %arg1: memref<8x128xf32, #tpu.memory_space<vmem>>, %arg2: memref<128x128xf32, #tpu.memory_space<vmem>>, %arg3: memref<8x128xf32, #tpu.memory_space<vmem>>) attributes {dimension_semantics = [#tpu.dimension_semantics<parallel>], iteration_bounds = array<i64: 1>, scalar_prefetch = 0 : i64, scratch_operands = 0 : i64, tpu.core_type = #tpu.core_type<tc>, window_params = [{transform_indices = @transform_0, window_bounds = array<i64: 8, 128>}, {pipeline_mode = #tpu.pipeline_mode<synchronous>, transform_indices = @transform_1, window_bounds = array<i64: 128, 128>}, {transform_indices = @transform_2, window_bounds = array<i64: 8, 128>}]} {
    %c0 = arith.constant 0 : index
    %c0_0 = arith.constant 0 : index
    %0 = vector.load %arg1[%c0, %c0_0] : memref<8x128xf32, #tpu.memory_space<vmem>>, vector<8x128xf32>
    %c0_1 = arith.constant 0 : index
    %c0_2 = arith.constant 0 : index
    %1 = vector.load %arg2[%c0_1, %c0_2] : memref<128x128xf32, #tpu.memory_space<vmem>>, vector<128x128xf32>
    %cst = arith.constant dense<0.000000e+00> : vector<8x128xf32>
    %2 = tpu.matmul %0, %1, %cst {dimension_numbers = #tpu.dot_dimension_numbers<[1], [0], [0], [1], [0, 0, 1, 1], [], []>} : vector<8x128xf32>, vector<128x128xf32>, vector<8x128xf32> -> vector<8x128xf32>
    %c0_3 = arith.constant 0 : index
    %c0_4 = arith.constant 0 : index
    %3 = vector.load %arg3[%c0_3, %c0_4] : memref<8x128xf32, #tpu.memory_space<vmem>>, vector<8x128xf32>
    tpu.vector_store %arg3[%c0_3, %c0_4], %2 {strides = array<i32>} : memref<8x128xf32, #tpu.memory_space<vmem>>, vector<8x128xf32>,
    return
  }
  func.func @transform_0(%arg0: i32) -> (i32, i32) {
    %c0_i32 = arith.constant 0 : i32
    %c0_i32_0 = arith.constant 0 : i32
    return %arg0, %c0_i32 : i32, i32
  }
  func.func @transform_1(%arg0: i32) -> (i32, i32) {
    %c0_i32 = arith.constant 0 : i32
    %c0_i32_0 = arith.constant 0 : i32
    %c0_i32_1 = arith.constant 0 : i32
    return %c0_i32, %c0_i32_0 : i32, i32
  }
  func.func @transform_2(%arg0: i32) -> (i32, i32) {
    %c0_i32 = arith.constant 0 : i32
    %c0_i32_0 = arith.constant 0 : i32
    return %arg0, %c0_i32 : i32, i32
  }
}

</mosaic_0001>

<bundles_post_ra>
// kernel: lr_layer_forward.1
= control target key start
LH: loop header
LB: loop body
LE: loop exit
PB: predicated region body
PF: predicated region fallthrough
CT: control target
= control target key end

     0   :  { %7 = vsyncpa [#allocation3], 0  ;;  %s309_s0 = inlined_call_operand.vmem [shape: f32[8,128], index: 0, kind: input, shape index: {}]   ;;  %s310_s1 = inlined_call_operand.hbm [shape: f32[128,128], index: 1, kind: input, shape index: {}]   ;;  %s311_s2 = inlined_call_operand.hbm [shape: f32[8,128], index: 2, kind: output, shape index: {}]  }
   0x1   :  { %8 = vsyncpa [#allocation4], 0  ;;  %s260_s9 = smov [#allocation2]   ;;  %s212_s13 = scalar_lea.hbm %s310_s1, 2048 }
   0x2   :  { %s16_s10 = sshll.u32 %s260_s9, 4  ;;  %p213_p0 = scmp.ne.s32.totalorder %s310_s1, %s212_s13  ;;  %s17_s10 = int_to_ptr.vmem [resolvable:$true] %s16_s10 }
   0x3   :  { %p216_p1 = scmp.lt.u32.totalorder %s212_s13, %s310_s1 }
   0x5   :  { %p218_p2 = pnand %p216_p1, %p213_p0 }
   0x7   :  { %221 = shalt.err (!%p218_p2)
}
   0x8   :  { %s222_s18 = scalar_lea.vmem %s17_s10, 2048  ;;  %p227_p4 = scmp.lt.s32.totalorder %s17_s10, %s17_s10 }
   0x9   :  { %p223_p3 = scmp.ne.s32.totalorder %s17_s10, %s222_s18  ;;  %p228_p5 = scmp.lt.s32.totalorder %s222_s18, %s222_s18 }
   0xb   :  { %p229_p6 = por %p228_p5, %p227_p4 }
   0xd   :  { %p230_p7 = pnand %p229_p6, %p223_p3 }
   0xf   :  { %233 = shalt.err (!%p230_p7)
}
  0x10   :  { %s261_s19 = smov 128   ;;  %s262_s20 = smov 8  }
  0x11   :  { %22 = dma.hbm_to_vmem [thread:$0]  %s310_s1, 2048, %s17_s10, [#allocation3], %s261_s19, %s261_s19, %s262_s20  }
  0x12   :  { %256 = dma.done.wait [#allocation3], 2048  }
  0x13   :  { %257 = vsyncadd [#allocation3], 4294965248  ;;  %v263_v0 = vmov 0.0|0.0   ;;  %vm264_vm0 = vmmov 0   ;;  %v265_v1 = vmov 0.0   ;;  %v27_v2 = vld [vmem:[#allocation2] sm:$0xff] }
  0x14   :  { %181 = vmatprep.subr.bf16.mxu0 %v263_v0  ;;  %178 = vmatprep.mubr.msk.f32.mxu0 %vm264_vm0, %v265_v1  ;;  %v28_v3 = vld [vmem:[#allocation2 + $0x8] sm:$0xff]  ;;  %v29_v4 = vld [vmem:[#allocation2 + $0x10] sm:$0xff]  ;;  %v30_v6 = vld [vmem:[#allocation2 + $0x18] sm:$0xff]  ;;  %s266_s24 = smov [#allocation5]  }
  0x15   :  { %v182_v5 = vpack.c.bf16 %v28_v3, %v27_v2  ;;  %v185_v7 = vpack.c.bf16 %v30_v6, %v29_v4  ;;  %v31_v8 = vld [vmem:[#allocation2 + $0x20] sm:$0xff]  ;;  %v32_v9 = vld [vmem:[#allocation2 + $0x28] sm:$0xff]  ;;  %v33_v11 = vld [vmem:[#allocation2 + $0x30] sm:$0xff]  ;;  %s120_s25 = sshll.u32 %s266_s24, 4  ;;  %s121_s25 = int_to_ptr.vmem [resolvable:$true] %s120_s25 }
  0x16   :  { %v188_v10 = vpack.c.bf16 %v32_v9, %v31_v8  ;;  %v34_v12 = vld [vmem:[#allocation2 + $0x38] sm:$0xff]  ;;  %v35_v14 = vld [vmem:[#allocation2 + $0x40] sm:$0xff]  ;;  %v36_v15 = vld [vmem:[#allocation2 + $0x48] sm:$0xff]  ;;  %s234_s26 = scalar_lea.vmem %s121_s25, 128  ;;  %p239_p9 = scmp.lt.s32.totalorder %s121_s25, %s121_s25 }
  0x17   :  { %183 = vmatpush3.bf16.msra.mxu0 %v182_v5  ;;  %v191_v13 = vpack.c.bf16 %v34_v12, %v33_v11  ;;  %v194_v16 = vpack.c.bf16 %v36_v15, %v35_v14  ;;  %v37_v17 = vld [vmem:[#allocation2 + $0x50] sm:$0xff]  ;;  %v38_v18 = vld [vmem:[#allocation2 + $0x58] sm:$0xff]  ;;  %v39_v20 = vld [vmem:[#allocation2 + $0x60] sm:$0xff]  ;;  %p235_p8 = scmp.ne.s32.totalorder %s121_s25, %s234_s26  ;;  %p240_p10 = scmp.lt.s32.totalorder %s234_s26, %s234_s26 }
  0x18   :  { %184 = vmatprep.subr.bf16.mxu0 %v263_v0  ;;  %v197_v19 = vpack.c.bf16 %v38_v18, %v37_v17  ;;  %v40_v21 = vld [vmem:[#allocation2 + $0x68] sm:$0xff]  ;;  %v41_v23 = vld [vmem:[#allocation2 + $0x70] sm:$0xff]  ;;  %v42_v24 = vld [vmem:[#allocation2 + $0x78] sm:$0xff] }
  0x19   :  { %v200_v22 = vpack.c.bf16 %v40_v21, %v39_v20  ;;  %v203_v25 = vpack.c.bf16 %v42_v24, %v41_v23  ;;  %v26_v26 = vld [vmem:[%s309_s0] sm:$0xff]  ;;  %p241_p11 = por %p240_p10, %p239_p9 }
  0x1b   :  { %186 = vmatpush3.bf16.msra.mxu0 %v185_v7  ;;  %p242_p12 = pnand %p241_p11, %p235_p8 }
  0x1c   :  { %187 = vmatprep.subr.bf16.mxu0 %v263_v0 }
  0x1f   :  { %189 = vmatpush3.bf16.msra.mxu0 %v188_v10 }
  0x20   :  { %190 = vmatprep.subr.bf16.mxu0 %v263_v0 }
  0x23   :  { %192 = vmatpush3.bf16.msra.mxu0 %v191_v13 }
  0x24   :  { %193 = vmatprep.subr.bf16.mxu0 %v263_v0 }
  0x27   :  { %195 = vmatpush3.bf16.msra.mxu0 %v194_v16 }
  0x28   :  { %196 = vmatprep.subr.bf16.mxu0 %v263_v0 }
  0x2b   :  { %198 = vmatpush3.bf16.msra.mxu0 %v197_v19 }
  0x2c   :  { %199 = vmatprep.subr.bf16.mxu0 %v263_v0 }
  0x2f   :  { %201 = vmatpush3.bf16.msra.mxu0 %v200_v22 }
  0x30   :  { %202 = vmatprep.subr.bf16.mxu0 %v263_v0 }
  0x33   :  { %204 = vmatpush3.bf16.msra.mxu0 %v203_v25 }
  0x36   :  { %179 = vmatmul.mubr.f32.vlgmr.msra.gmra.mrb[0].mxu0 %v26_v26 }
 0x109   :  { %v109_v27 = vpop.f32.mrb[0].mxu0 }
 0x10a   :  { %113 = vst [vmem:[#allocation5] sm:$0xff] %v109_v27  ;;  %v180_v28 = vpop.f32.mrb[1].mxu0 }
 0x10b   :  { %245 = shalt.err (!%p242_p12)
}
 0x10c   :  { %s246_s29 = scalar_lea.hbm %s311_s2, 128 }
 0x10d   :  { %p247_p13 = scmp.ne.s32.totalorder %s311_s2, %s246_s29  ;;  %p250_p0 = scmp.lt.u32.totalorder %s246_s29, %s311_s2 }
 0x10f   :  { %p252_p1 = pnand %p250_p0, %p247_p13 }
 0x111   :  { %255 = shalt.err (!%p252_p1)
}
 0x112   :  { %123 = dma.vmem_to_hbm [thread:$0]  %s121_s25, 128, %s311_s2, [#allocation4]  }
 0x113   :  { %258 = dma.done.wait [#allocation4], 128  }
 0x114   :  { %259 = vsyncadd [#allocation4], 4294967168 }
 0x115   :  { %127 = vsyncpa [#allocation3], 1 }
 0x116   :  { %128 = vsyncpa [#allocation4], 1 }

</bundles_post_ra>
